<compile_context>
chip_gen: v7x
topology: tpu7x:2x2x1
jax: 0.10.0
libtpu: 0.0.40
codegen_flags: <defaults>
</compile_context>

<pallas_src>
import math
from functools import partial

import jax
import jax.numpy as jnp
from jax import lax
from jax.experimental import pallas as pl
from jax.experimental.pallas import tpu as pltpu

MAX_FREQ = 3
HIDDEN_DIM = 32
SHIFT = 1
F = 2 * MAX_FREQ + 1          # 7 spherical-harmonic features
LANES = 128                   # points per lane row
MAX_TILE_ROWS = 32            # up to 32 * 128 = 4096 points per grid step


def _norm_const(l: int, m: int) -> float:
    """sqrt((2l+1)/(4pi) * (l-m)!/(l+m)!)"""
    return math.sqrt(
        (2 * l + 1) / (4.0 * math.pi) * math.factorial(l - m) / math.factorial(l + m)
    )


def _assoc_legendre_unrolled(p: int, l: int, cx, sx):
    """P_l^p(cx) with Condon-Shortley phase; cx=cos(phi), sx=sin(phi) >= 0.

    p, l are Python ints -> fully unrolled into pure elementwise VPU ops.
    """
    pmm = jnp.ones_like(cx)
    for k in range(1, p + 1):
        pmm = pmm * (-(2.0 * k - 1.0)) * sx              # P_p^p
    if l == p:
        return pmm
    pm1 = cx * (2.0 * p + 1.0) * pmm                      # P_{p+1}^p
    if l == p + 1:
        return pm1
    p_prev2, p_prev1 = pmm, pm1
    for ll in range(p + 2, l + 1):
        p_cur = ((2.0 * ll - 1.0) * cx * p_prev1 - (ll + p - 1.0) * p_prev2) / (ll - p)
        p_prev2, p_prev1 = p_prev1, p_cur
    return p_prev1


def _spherical_filter_kernel(coords_ref, w_ref, out_ref, *,
                             max_freq: int, shift: int, tile_rows: int, f_pad: int):
    # coords_ref: (2, tile_rows, 128): [0] = theta (azimuth), [1] = phi (polar)
    theta = coords_ref[0]                                  # (tile_rows, 128), lane-dense
    phi = coords_ref[1]

    # Four transcendentals per point total; higher harmonics of theta come from the
    # Chebyshev multiple-angle recurrence (plain VPU FMAs).
    ct = jnp.cos(theta)
    st = jnp.sin(theta)
    cp = jnp.cos(phi)
    sp = jnp.sin(phi)
    cos_m = [jnp.ones_like(ct), ct]
    sin_m = [jnp.zeros_like(st), st]
    for m in range(2, max_freq + 1):
        cos_m.append(2.0 * ct * cos_m[-1] - cos_m[-2])
        sin_m.append(2.0 * ct * sin_m[-1] - sin_m[-2])

    # Real spherical harmonics, each (tile_rows, 128), lane-dense.
    feats = []
    for m in range(-max_freq, max_freq + 1):
        p = abs(m)
        l = p + shift
        P = _assoc_legendre_unrolled(p, l, cp, sp)
        n_lp = _norm_const(l, p)
        if m == 0:
            y = n_lp * P
        elif m > 0:
            y = (((-1.0) ** m) * math.sqrt(2.0) * n_lp) * (cos_m[m] * P)
        else:
            y = (((-1.0) ** p) * math.sqrt(2.0) * n_lp) * (sin_m[p] * P)
        feats.append(y)

    # Bias is folded in as a constant-one feature (its weight row is the bias vector);
    # remaining rows (if any) are zero padding up to a multiple of 8.
    feats.append(jnp.ones_like(cp))
    while len(feats) < f_pad:
        feats.append(jnp.zeros_like(cp))

    # (f_pad, tile_rows, 128) -> (f_pad, TILE_N): one small relayout (8 values/point),
    # then a single MXU matmul performs the F -> H contraction for the whole tile:
    #   out[n, h] = sum_f y[f, n] * w[f, h]
    y_all = jnp.stack(feats, axis=0)
    y_all = y_all.reshape(f_pad, tile_rows * LANES)
    out = lax.dot_general(
        y_all, w_ref[...],
        dimension_numbers=(((0,), (0,)), ((), ())),
        preferred_element_type=jnp.float32)
    out_ref[...] = out.astype(out_ref.dtype)


def spherical_filter(x, weight, bias, *, max_freq: int = MAX_FREQ, shift: int = SHIFT):
    """x: (..., h, w, 1, 2); weight: (H, 2*max_freq+1) (PyTorch Linear layout); bias: (H,)."""
    lead_shape = x.shape[:-1]                              # (..., h, w, 1)
    n = int(math.prod(lead_shape))
    h_dim, f_dim = weight.shape
    assert f_dim == 2 * max_freq + 1
    f_pad = ((f_dim + 1 + 7) // 8) * 8                     # features + bias row, rounded to 8

    # Coordinates packed lane-dense: (2, n_rows, 128) -> one block DMA per grid step.
    coords = jnp.transpose(x.reshape(n, 2).astype(jnp.float32))        # (2, N)
    n_rows = pl.cdiv(n, LANES)
    tile_rows = min(MAX_TILE_ROWS, n_rows)
    n_rows_pad = pl.cdiv(n_rows, tile_rows) * tile_rows
    n_pad = n_rows_pad * LANES
    if n_pad != n:
        coords = jnp.pad(coords, ((0, 0), (0, n_pad - n)))
    coords = coords.reshape(2, n_rows_pad, LANES)

    # Fused weight: rows [0:F] = W^T, row F = bias, remaining rows zero.
    w_fused = jnp.zeros((f_pad, h_dim), jnp.float32)
    w_fused = w_fused.at[:f_dim].set(jnp.transpose(weight).astype(jnp.float32))
    w_fused = w_fused.at[f_dim].set(bias.astype(jnp.float32))

    tile_n = tile_rows * LANES
    grid_len = n_rows_pad // tile_rows

    out = pl.pallas_call(
        partial(_spherical_filter_kernel, max_freq=max_freq, shift=shift,
                tile_rows=tile_rows, f_pad=f_pad),
        out_shape=jax.ShapeDtypeStruct((n_pad, h_dim), jnp.float32),
        grid_spec=pltpu.PrefetchScalarGridSpec(
            num_scalar_prefetch=0,
            grid=(grid_len,),
            in_specs=[
                pl.BlockSpec((2, tile_rows, LANES), lambda i: (0, i, 0)),   # coords
                pl.BlockSpec((f_pad, h_dim), lambda i: (0, 0)),             # fused W^T / bias
            ],
            out_specs=pl.BlockSpec((tile_n, h_dim), lambda i: (i, 0)),
        ),
        compiler_params=pltpu.CompilerParams(dimension_semantics=("parallel",)),
    )(coords, w_fused)

    if n_pad != n:            # only copies when padding was actually required
        out = out[:n]
    return out.reshape(*lead_shape, h_dim)


def _reference(x, weight, bias, max_freq, shift):
    """Pure-JAX reference using closed-form associated Legendre polynomials and direct
    cos(m*theta)/sin(m*theta) — independent of the kernel's recurrences, layout and MXU path.

    Sign convention checked against the tabulated real spherical harmonics (which equal the
    module's complex->real combination of scipy sph_harm values), e.g.
      Y_{1,0} = sqrt(3/4pi) cos(phi),  Y_{2,+1} = sqrt(15/4pi) sin(phi) cos(phi) cos(theta).
    """
    assert max_freq == 3 and shift == 1
    theta = x[..., 0].astype(jnp.float32)
    phi = x[..., 1].astype(jnp.float32)
    c = jnp.cos(phi)
    s = jnp.sin(phi)
    # P_l^p(cos phi), Condon-Shortley phase included, closed forms for l = p + 1:
    P = {
        (0, 1): c,
        (1, 2): -3.0 * c * s,
        (2, 3): 15.0 * c * s * s,
        (3, 4): -105.0 * c * s * s * s,
    }
    feats = []
    for m in range(-max_freq, max_freq + 1):
        p = abs(m)
        l = p + shift
        n_lp = _norm_const(l, p)
        if m == 0:
            y = n_lp * P[(p, l)]
        elif m > 0:
            y = ((-1.0) ** m) * math.sqrt(2.0) * n_lp * jnp.cos(m * theta) * P[(p, l)]
        else:
            y = ((-1.0) ** p) * math.sqrt(2.0) * n_lp * jnp.sin(p * theta) * P[(p, l)]
        feats.append(y)
    Y = jnp.stack(feats, axis=-1)                           # (..., F)
    return Y @ jnp.transpose(weight).astype(jnp.float32) + bias.astype(jnp.float32)


if __name__ == "__main__":
    key = jax.random.PRNGKey(0)
    k_theta, k_phi, k_w, k_b = jax.random.split(key, 4)

    batch, h, w = 2, 16, 16
    theta_in = jax.random.uniform(k_theta, (batch, h, w, 1),
                                  minval=0.0, maxval=2.0 * math.pi)
    phi_in = jax.random.uniform(k_phi, (batch, h, w, 1),
                                minval=0.0, maxval=math.pi)
    x = jnp.stack([theta_in, phi_in], axis=-1)              # (2, 16, 16, 1, 2)

    # Deterministic nn.Linear(F, H) params (PyTorch default init U(-1/sqrt(F), 1/sqrt(F))).
    bound = 1.0 / math.sqrt(F)
    weight = jax.random.uniform(k_w, (HIDDEN_DIM, F), minval=-bound, maxval=bound)
    bias = jax.random.uniform(k_b, (HIDDEN_DIM,), minval=-bound, maxval=bound)

    out = spherical_filter(x, weight, bias, max_freq=MAX_FREQ, shift=SHIFT)
    out = jax.block_until_ready(out)
    assert out.shape == (batch, h, w, 1, HIDDEN_DIM), out.shape

    ref = _reference(x, weight, bias, MAX_FREQ, SHIFT)
    max_err = float(jnp.abs(out - ref).max())
    assert jnp.allclose(out, ref, atol=1e-4, rtol=1e-4), max_err

    # TODO(synk): the module's per-input cache (self.cache) is a host-side memo with no
    # on-device equivalent; spherical-harmonic features are recomputed on every call.
    print("KERNEL_OK")
</pallas_src>

<mosaic_0001>
module attributes {stable_mosaic.version = 11 : i64} {
  func.func @_spherical_filter_kernel(%arg0: i32, %arg1: memref<2x4x128xf32, #tpu.memory_space<vmem>>, %arg2: memref<8x32xf32, #tpu.memory_space<vmem>>, %arg3: memref<512x32xf32, #tpu.memory_space<vmem>>) attributes {dimension_semantics = [#tpu.dimension_semantics<parallel>], iteration_bounds = array<i64: 1>, scalar_prefetch = 0 : i64, scratch_operands = 0 : i64, tpu.core_type = #tpu.core_type<tc>, window_params = [{transform_indices = @transform_0, window_bounds = array<i64: 2, 4, 128>}, {pipeline_mode = #tpu.pipeline_mode<synchronous>, transform_indices = @transform_1, window_bounds = array<i64: 8, 32>}, {transform_indices = @transform_2, window_bounds = array<i64: 512, 32>}]} {
    %c0 = arith.constant 0 : index
    %c0_0 = arith.constant 0 : index
    %c0_1 = arith.constant 0 : index
    %0 = vector.load %arg1[%c0, %c0_0, %c0_1] : memref<2x4x128xf32, #tpu.memory_space<vmem>>, vector<1x4x128xf32>
    %1 = vector.shape_cast %0 : vector<1x4x128xf32> to vector<4x128xf32>
    %c1 = arith.constant 1 : index
    %c0_2 = arith.constant 0 : index
    %c0_3 = arith.constant 0 : index
    %2 = vector.load %arg1[%c1, %c0_2, %c0_3] : memref<2x4x128xf32, #tpu.memory_space<vmem>>, vector<1x4x128xf32>
    %3 = vector.shape_cast %2 : vector<1x4x128xf32> to vector<4x128xf32>
    %4 = math.cos %1 : vector<4x128xf32>
    %5 = math.sin %1 : vector<4x128xf32>
    %6 = math.cos %3 : vector<4x128xf32>
    %7 = math.sin %3 : vector<4x128xf32>
    %cst = arith.constant 1.000000e+00 : f32
    %8 = vector.broadcast %cst : f32 to vector<4x128xf32>
    %cst_4 = arith.constant 0.000000e+00 : f32
    %9 = vector.broadcast %cst_4 : f32 to vector<4x128xf32>
    %cst_5 = arith.constant 2.000000e+00 : f32
    %10 = vector.broadcast %cst_5 : f32 to vector<4x128xf32>
    %11 = arith.mulf %10, %4 : vector<4x128xf32>
    %12 = arith.mulf %11, %4 : vector<4x128xf32>
    %13 = arith.subf %12, %8 : vector<4x128xf32>
    %cst_6 = arith.constant 2.000000e+00 : f32
    %14 = vector.broadcast %cst_6 : f32 to vector<4x128xf32>
    %15 = arith.mulf %14, %4 : vector<4x128xf32>
    %16 = arith.mulf %15, %5 : vector<4x128xf32>
    %17 = arith.subf %16, %9 : vector<4x128xf32>
    %cst_7 = arith.constant 2.000000e+00 : f32
    %18 = vector.broadcast %cst_7 : f32 to vector<4x128xf32>
    %19 = arith.mulf %18, %4 : vector<4x128xf32>
    %20 = arith.mulf %19, %13 : vector<4x128xf32>
    %21 = arith.subf %20, %4 : vector<4x128xf32>
    %cst_8 = arith.constant 2.000000e+00 : f32
    %22 = vector.broadcast %cst_8 : f32 to vector<4x128xf32>
    %23 = arith.mulf %22, %4 : vector<4x128xf32>
    %24 = arith.mulf %23, %17 : vector<4x128xf32>
    %25 = arith.subf %24, %5 : vector<4x128xf32>
    %cst_9 = arith.constant 1.000000e+00 : f32
    %26 = vector.broadcast %cst_9 : f32 to vector<4x128xf32>
    %cst_10 = arith.constant -1.000000e+00 : f32
    %27 = vector.broadcast %cst_10 : f32 to vector<4x128xf32>
    %28 = arith.mulf %26, %27 : vector<4x128xf32>
    %29 = arith.mulf %28, %7 : vector<4x128xf32>
    %cst_11 = arith.constant -3.000000e+00 : f32
    %30 = vector.broadcast %cst_11 : f32 to vector<4x128xf32>
    %31 = arith.mulf %29, %30 : vector<4x128xf32>
    %32 = arith.mulf %31, %7 : vector<4x128xf32>
    %cst_12 = arith.constant -5.000000e+00 : f32
    %33 = vector.broadcast %cst_12 : f32 to vector<4x128xf32>
    %34 = arith.mulf %32, %33 : vector<4x128xf32>
    %35 = arith.mulf %34, %7 : vector<4x128xf32>
    %cst_13 = arith.constant 7.000000e+00 : f32
    %36 = vector.broadcast %cst_13 : f32 to vector<4x128xf32>
    %37 = arith.mulf %6, %36 : vector<4x128xf32>
    %38 = arith.mulf %37, %35 : vector<4x128xf32>
    %39 = arith.mulf %25, %38 : vector<4x128xf32>
    %cst_14 = arith.constant -0.0168583877 : f32
    %40 = vector.broadcast %cst_14 : f32 to vector<4x128xf32>
    %41 = arith.mulf %40, %39 : vector<4x128xf32>
    %cst_15 = arith.constant 1.000000e+00 : f32
    %42 = vector.broadcast %cst_15 : f32 to vector<4x128xf32>
    %cst_16 = arith.constant -1.000000e+00 : f32
    %43 = vector.broadcast %cst_16 : f32 to vector<4x128xf32>
    %44 = arith.mulf %42, %43 : vector<4x128xf32>
    %45 = arith.mulf %44, %7 : vector<4x128xf32>
    %cst_17 = arith.constant -3.000000e+00 : f32
    %46 = vector.broadcast %cst_17 : f32 to vector<4x128xf32>
    %47 = arith.mulf %45, %46 : vector<4x128xf32>
    %48 = arith.mulf %47, %7 : vector<4x128xf32>
    %cst_18 = arith.constant 5.000000e+00 : f32
    %49 = vector.broadcast %cst_18 : f32 to vector<4x128xf32>
    %50 = arith.mulf %6, %49 : vector<4x128xf32>
    %51 = arith.mulf %50, %48 : vector<4x128xf32>
    %52 = arith.mulf %17, %51 : vector<4x128xf32>
    %cst_19 = arith.constant 0.0963537171 : f32
    %53 = vector.broadcast %cst_19 : f32 to vector<4x128xf32>
    %54 = arith.mulf %53, %52 : vector<4x128xf32>
    %cst_20 = arith.constant 1.000000e+00 : f32
    %55 = vector.broadcast %cst_20 : f32 to vector<4x128xf32>
    %cst_21 = arith.constant -1.000000e+00 : f32
    %56 = vector.broadcast %cst_21 : f32 to vector<4x128xf32>
    %57 = arith.mulf %55, %56 : vector<4x128xf32>
    %58 = arith.mulf %57, %7 : vector<4x128xf32>
    %cst_22 = arith.constant 3.000000e+00 : f32
    %59 = vector.broadcast %cst_22 : f32 to vector<4x128xf32>
    %60 = arith.mulf %6, %59 : vector<4x128xf32>
    %61 = arith.mulf %60, %58 : vector<4x128xf32>
    %62 = arith.mulf %5, %61 : vector<4x128xf32>
    %cst_23 = arith.constant -0.3641828 : f32
    %63 = vector.broadcast %cst_23 : f32 to vector<4x128xf32>
    %64 = arith.mulf %63, %62 : vector<4x128xf32>
    %cst_24 = arith.constant 1.000000e+00 : f32
    %65 = vector.broadcast %cst_24 : f32 to vector<4x128xf32>
    %cst_25 = arith.constant 1.000000e+00 : f32
    %66 = vector.broadcast %cst_25 : f32 to vector<4x128xf32>
    %67 = arith.mulf %6, %66 : vector<4x128xf32>
    %68 = arith.mulf %67, %65 : vector<4x128xf32>
    %cst_26 = arith.constant 0.488602519 : f32
    %69 = vector.broadcast %cst_26 : f32 to vector<4x128xf32>
    %70 = arith.mulf %69, %68 : vector<4x128xf32>
    %cst_27 = arith.constant 1.000000e+00 : f32
    %71 = vector.broadcast %cst_27 : f32 to vector<4x128xf32>
    %cst_28 = arith.constant -1.000000e+00 : f32
    %72 = vector.broadcast %cst_28 : f32 to vector<4x128xf32>
    %73 = arith.mulf %71, %72 : vector<4x128xf32>
    %74 = arith.mulf %73, %7 : vector<4x128xf32>
    %cst_29 = arith.constant 3.000000e+00 : f32
    %75 = vector.broadcast %cst_29 : f32 to vector<4x128xf32>
    %76 = arith.mulf %6, %75 : vector<4x128xf32>
    %77 = arith.mulf %76, %74 : vector<4x128xf32>
    %78 = arith.mulf %4, %77 : vector<4x128xf32>
    %cst_30 = arith.constant -0.3641828 : f32
    %79 = vector.broadcast %cst_30 : f32 to vector<4x128xf32>
    %80 = arith.mulf %79, %78 : vector<4x128xf32>
    %cst_31 = arith.constant 1.000000e+00 : f32
    %81 = vector.broadcast %cst_31 : f32 to vector<4x128xf32>
    %cst_32 = arith.constant -1.000000e+00 : f32
    %82 = vector.broadcast %cst_32 : f32 to vector<4x128xf32>
    %83 = arith.mulf %81, %82 : vector<4x128xf32>
    %84 = arith.mulf %83, %7 : vector<4x128xf32>
    %cst_33 = arith.constant -3.000000e+00 : f32
    %85 = vector.broadcast %cst_33 : f32 to vector<4x128xf32>
    %86 = arith.mulf %84, %85 : vector<4x128xf32>
    %87 = arith.mulf %86, %7 : vector<4x128xf32>
    %cst_34 = arith.constant 5.000000e+00 : f32
    %88 = vector.broadcast %cst_34 : f32 to vector<4x128xf32>
    %89 = arith.mulf %6, %88 : vector<4x128xf32>
    %90 = arith.mulf %89, %87 : vector<4x128xf32>
    %91 = arith.mulf %13, %90 : vector<4x128xf32>
    %cst_35 = arith.constant 0.0963537171 : f32
    %92 = vector.broadcast %cst_35 : f32 to vector<4x128xf32>
    %93 = arith.mulf %92, %91 : vector<4x128xf32>
    %cst_36 = arith.constant 1.000000e+00 : f32
    %94 = vector.broadcast %cst_36 : f32 to vector<4x128xf32>
    %cst_37 = arith.constant -1.000000e+00 : f32
    %95 = vector.broadcast %cst_37 : f32 to vector<4x128xf32>
    %96 = arith.mulf %94, %95 : vector<4x128xf32>
    %97 = arith.mulf %96, %7 : vector<4x128xf32>
    %cst_38 = arith.constant -3.000000e+00 : f32
    %98 = vector.broadcast %cst_38 : f32 to vector<4x128xf32>
    %99 = arith.mulf %97, %98 : vector<4x128xf32>
    %100 = arith.mulf %99, %7 : vector<4x128xf32>
    %cst_39 = arith.constant -5.000000e+00 : f32
    %101 = vector.broadcast %cst_39 : f32 to vector<4x128xf32>
    %102 = arith.mulf %100, %101 : vector<4x128xf32>
    %103 = arith.mulf %102, %7 : vector<4x128xf32>
    %cst_40 = arith.constant 7.000000e+00 : f32
    %104 = vector.broadcast %cst_40 : f32 to vector<4x128xf32>
    %105 = arith.mulf %6, %104 : vector<4x128xf32>
    %106 = arith.mulf %105, %103 : vector<4x128xf32>
    %107 = arith.mulf %21, %106 : vector<4x128xf32>
    %cst_41 = arith.constant -0.0168583877 : f32
    %108 = vector.broadcast %cst_41 : f32 to vector<4x128xf32>
    %109 = arith.mulf %108, %107 : vector<4x128xf32>
    %cst_42 = arith.constant 1.000000e+00 : f32
    %110 = vector.broadcast %cst_42 : f32 to vector<4x128xf32>
    %111 = vector.shape_cast %41 : vector<4x128xf32> to vector<1x4x128xf32>
    %112 = vector.shape_cast %54 : vector<4x128xf32> to vector<1x4x128xf32>
    %113 = vector.shape_cast %64 : vector<4x128xf32> to vector<1x4x128xf32>
    %114 = vector.shape_cast %70 : vector<4x128xf32> to vector<1x4x128xf32>
    %115 = vector.shape_cast %80 : vector<4x128xf32> to vector<1x4x128xf32>
    %116 = vector.shape_cast %93 : vector<4x128xf32> to vector<1x4x128xf32>
    %117 = vector.shape_cast %109 : vector<4x128xf32> to vector<1x4x128xf32>
    %118 = vector.shape_cast %110 : vector<4x128xf32> to vector<1x4x128xf32>
    %119 = tpu.concatenate %111, %112, %113, %114, %115, %116, %117, %118 in 0 : vector<1x4x128xf32>, vector<1x4x128xf32>, vector<1x4x128xf32>, vector<1x4x128xf32>, vector<1x4x128xf32>, vector<1x4x128xf32>, vector<1x4x128xf32>, vector<1x4x128xf32> -> vector<8x4x128xf32>
    %120 = vector.shape_cast %119 : vector<8x4x128xf32> to vector<8x512xf32>
    %c0_43 = arith.constant 0 : index
    %c0_44 = arith.constant 0 : index
    %121 = vector.load %arg2[%c0_43, %c0_44] : memref<8x32xf32, #tpu.memory_space<vmem>>, vector<8x32xf32>
    %cst_45 = arith.constant dense<0.000000e+00> : vector<512x32xf32>
    %122 = tpu.matmul %120, %121, %cst_45 {dimension_numbers = #tpu.dot_dimension_numbers<[0], [0], [1], [1], [0, 1, 1, 1], [], []>} : vector<8x512xf32>, vector<8x32xf32>, vector<512x32xf32> -> vector<512x32xf32>
    %c0_46 = arith.constant 0 : index
    %c0_47 = arith.constant 0 : index
    %123 = vector.load %arg3[%c0_46, %c0_47] : memref<512x32xf32, #tpu.memory_space<vmem>>, vector<512x32xf32>
    tpu.vector_store %arg3[%c0_46, %c0_47], %122 {strides = array<i32>} : memref<512x32xf32, #tpu.memory_space<vmem>>, vector<512x32xf32>,
    return
  }
  func.func @transform_0(%arg0: i32) -> (i32, i32, i32) {
    %c0_i32 = arith.constant 0 : i32
    %c0_i32_0 = arith.constant 0 : i32
    %c0_i32_1 = arith.constant 0 : i32
    return %c0_i32, %arg0, %c0_i32_0 : i32, i32, i32
  }
  func.func @transform_1(%arg0: i32) -> (i32, i32) {
    %c0_i32 = arith.constant 0 : i32
    %c0_i32_0 = arith.constant 0 : i32
    %c0_i32_1 = arith.constant 0 : i32
    return %c0_i32, %c0_i32_0 : i32, i32
  }
  func.func @transform_2(%arg0: i32) -> (i32, i32) {
    %c0_i32 = arith.constant 0 : i32
    %c0_i32_0 = arith.constant 0 : i32
    return %arg0, %c0_i32 : i32, i32
  }
}

</mosaic_0001>

<bundles_post_ra>
// kernel: tpu_custom_call.1
= control target key start
LH: loop header
LB: loop body
LE: loop exit
PB: predicated region body
PF: predicated region fallthrough
CT: control target
= control target key end

     0   :  { %7 = vsyncpa [#allocation3], 0  ;;  %s2108_s0 = inlined_call_operand.hbm [shape: f32[2,4,128], index: 0, kind: input, shape index: {}]   ;;  %s2109_s1 = inlined_call_operand.hbm [shape: f32[8,32], index: 1, kind: input, shape index: {}]   ;;  %s2110_s2 = inlined_call_operand.vmem [shape: f32[512,32], index: 2, kind: output, shape index: {}]  }
   0x1   :  { %8 = vsyncpa [#allocation5], 0  ;;  %s1656_s9 = smov [#allocation2]   ;;  %s1608_s13 = scalar_lea.hbm %s2108_s0, 128 }
   0x2   :  { %s14_s10 = sshll.u32 %s1656_s9, 4  ;;  %p1609_p0 = scmp.ne.s32.totalorder %s2108_s0, %s1608_s13  ;;  %s15_s10 = int_to_ptr.vmem [resolvable:$true] %s14_s10 }
   0x3   :  { %p1612_p1 = scmp.lt.u32.totalorder %s1608_s13, %s2108_s0 }
   0x5   :  { %p1614_p2 = pnand %p1612_p1, %p1609_p0 }
   0x7   :  { %1617 = shalt.err (!%p1614_p2)
}
   0x8   :  { %s1618_s18 = scalar_lea.vmem %s15_s10, 128  ;;  %p1623_p4 = scmp.lt.s32.totalorder %s15_s10, %s15_s10 }
   0x9   :  { %p1619_p3 = scmp.ne.s32.totalorder %s15_s10, %s1618_s18  ;;  %p1624_p5 = scmp.lt.s32.totalorder %s1618_s18, %s1618_s18 }
   0xb   :  { %p1625_p6 = por %p1624_p5, %p1623_p4 }
   0xd   :  { %p1626_p7 = pnand %p1625_p6, %p1619_p3 }
   0xf   :  { %1629 = shalt.err (!%p1626_p7)
}
  0x10   :  { %s1657_s19 = smov 64   ;;  %s1658_s20 = smov 4  }
  0x11   :  { %20 = dma.hbm_to_vmem [thread:$0]  %s2108_s0, 128, %s15_s10, [#allocation3], %s1657_s19, %s1657_s19, %s1658_s20  }
  0x12   :  { %s1659_s23 = smov [#allocation4]   ;;  %s1630_s27 = scalar_lea.hbm %s2109_s1, 128 }
  0x13   :  { %s27_s24 = sshll.u32 %s1659_s23, 4  ;;  %p1631_p8 = scmp.ne.s32.totalorder %s2109_s1, %s1630_s27  ;;  %s28_s24 = int_to_ptr.vmem [resolvable:$true] %s27_s24 }
  0x14   :  { %p1634_p9 = scmp.lt.u32.totalorder %s1630_s27, %s2109_s1 }
  0x16   :  { %p1636_p10 = pnand %p1634_p9, %p1631_p8 }
  0x18   :  { %1639 = shalt.err (!%p1636_p10)
}
  0x19   :  { %s1640_s4 = scalar_lea.vmem %s28_s24, 128  ;;  %p1645_p12 = scmp.lt.s32.totalorder %s28_s24, %s28_s24 }
  0x1a   :  { %p1641_p11 = scmp.ne.s32.totalorder %s28_s24, %s1640_s4  ;;  %p1646_p13 = scmp.lt.s32.totalorder %s1640_s4, %s1640_s4 }
  0x1c   :  { %p1647_p0 = por %p1646_p13, %p1645_p12 }
  0x1e   :  { %p1648_p1 = pnand %p1647_p0, %p1641_p11 }
  0x20   :  { %1651 = shalt.err (!%p1648_p1)
}
  0x21   :  { %30 = dma.hbm_to_vmem [thread:$0]  %s2109_s1, 128, %s28_s24, [#allocation5]  }
  0x22   :  { %1652 = dma.done.wait [#allocation3], 128  }
  0x23   :  { %1653 = vsyncadd [#allocation3], 4294967168 }
  0x24   :  { %1654 = dma.done.wait [#allocation5], 128  }
  0x25   :  { %1655 = vsyncadd [#allocation5], 4294967168  ;;  %v1708_v0 = vld [vmem:[#allocation2] sm:$0xf]  ;;  %v1710_v1 = vld [vmem:[#allocation2 + $0x4] sm:$0xf] }
  0x26   :  { %v40_v2 = vand.u32 2147483647, %v1708_v0  ;;  %v43_v3 = vand.u32 2139095040, %v1708_v0  ;;  %v247_v4 = vand.u32 2147483647, %v1710_v1  ;;  %v250_v5 = vand.u32 2139095040, %v1710_v1 }
  0x27   :  { %v1660_v24 = vmov 683565275   ;;  %v1661_v26 = vmov 2475754826   ;;  %v1662_v28 = vmov 2131351028  }
  0x28   :  { %v44_v6 = vshrl.u32 %v43_v3, 23  ;;  %v47_v7 = vand.u32 8388607, %v40_v2  ;;  %v251_v8 = vshrl.u32 %v250_v5, 23  ;;  %v254_v9 = vand.u32 8388607, %v247_v4 }
  0x29   :  { %v1663_v30 = vmov 2102212464   ;;  %v1664_v32 = vmov 920167782   ;;  %v1665_v40 = vmov 1326507024  }
  0x2a   :  { %v1332_v10 = vadd.s32 4294967169, %v44_v6  ;;  %v1340_v11 = vadd.s32 4294967169, %v251_v8  ;;  %v48_v13 = vor.u32 8388608, %v47_v7  ;;  %v255_v14 = vor.u32 8388608, %v254_v9 }
  0x2b   :  { %vm42_vm14 = vcmp.lt.s32.totalorder %v1708_v0, 0  ;;  %vm41_vm15 = vcmp.le.f32.partialorder %v40_v2, 0.7853982 }
  0x2c   :  { %v50_v12 = vadd.s32 1, %v1332_v10  ;;  %v257_v15 = vadd.s32 1, %v1340_v11  ;;  %v1720_v20 = vshll.u32 %v48_v13, 8  ;;  %v1722_v22 = vshll.u32 %v255_v14, 8 }
  0x2e   :  { %vm51_vm0 = vcmp.gt.s32.totalorder %v50_v12, 0  ;;  %vm258_vm1 = vcmp.gt.s32.totalorder %v257_v15, 0 }
  0x2f   :  { %v52_v16 = vsel %vm51_vm0, %v50_v12, 0  ;;  %v259_v19 = vsel %vm258_vm1, %v257_v15, 0  ;;  %vm249_vm0 = vcmp.lt.s32.totalorder %v1710_v1, 0  ;;  %vm248_vm1 = vcmp.le.f32.partialorder %v247_v4, 0.7853982 }
  0x30   :  { %v53_v17 = vshrl.u32 %v52_v16, 5  ;;  %v54_v18 = vand.u32 31, %v52_v16  ;;  %v261_v21 = vand.u32 31, %v259_v19  ;;  %v1724_v34 = vshrl.u32 %v259_v19, 5 }
  0x32   :  { %v55_v23 = vsub.s32 32, %v54_v18  ;;  %v57_v25 = vshll.u32 %v1660_v24, %v54_v18  ;;  %v60_v27 = vshll.u32 %v1661_v26, %v54_v18  ;;  %v63_v29 = vshll.u32 %v1662_v28, %v54_v18 }
  0x33   :  { %v66_v31 = vshll.u32 %v1663_v30, %v54_v18  ;;  %v69_v33 = vshll.u32 %v1664_v32, %v54_v18  ;;  %vm72_vm2 = vcmp.lt.s32.totalorder %v53_v17, 1  ;;  %vm73_vm3 = vcmp.lt.s32.totalorder %v53_v17, 2 }
  0x34   :  { %v56_v35 = vshrl.u32 %v1660_v24, %v55_v23  ;;  %v58_v36 = vshrl.u32 %v1661_v26, %v55_v23  ;;  %v61_v37 = vshrl.u32 %v1662_v28, %v55_v23  ;;  %v64_v38 = vshrl.u32 %v1663_v30, %v55_v23 }
  0x35   :  { %v67_v39 = vshrl.u32 %v1664_v32, %v55_v23  ;;  %v70_v41 = vshrl.u32 %v1665_v40, %v55_v23  ;;  %vm75_vm4 = vcmp.lt.s32.totalorder %v53_v17, 4  ;;  %v262_v45 = vsub.s32 32, %v261_v21 }
  0x36   :  { %v59_v42 = vor.u32 %v58_v36, %v57_v25  ;;  %v62_v43 = vor.u32 %v61_v37, %v60_v27  ;;  %v65_v44 = vor.u32 %v64_v38, %v63_v29  ;;  %vm74_vm5 = vcmp.lt.s32.totalorder %v53_v17, 3 }
  0x37   :  { %v68_v46 = vor.u32 %v67_v39, %v66_v31  ;;  %v71_v47 = vor.u32 %v70_v41, %v69_v33  ;;  %v264_v48 = vshll.u32 %v1660_v24, %v261_v21  ;;  %v267_v56 = vshll.u32 %v1661_v26, %v261_v21 }
  0x38   :  { %v76_v49 = vsel %vm72_vm2, %v56_v35, %v59_v42  ;;  %v77_v50 = vsel %vm75_vm4, %v65_v44, 2102212464  ;;  %v80_v51 = vsel %vm72_vm2, %v59_v42, %v62_v43  ;;  %v84_v52 = vsel %vm72_vm2, %v62_v43, %v65_v44 }
  0x39   :  { %v78_v53 = vsel %vm74_vm5, %v62_v43, %v77_v50  ;;  %v81_v54 = vsel %vm75_vm4, %v68_v46, 920167782  ;;  %v85_v55 = vsel %vm75_vm4, %v71_v47, 1326507024  ;;  %v263_v59 = vshrl.u32 %v1660_v24, %v262_v45 }
  0x3a   :  { %v82_v57 = vsel %vm74_vm5, %v65_v44, %v81_v54  ;;  %v86_v58 = vsel %vm74_vm5, %v68_v46, %v85_v55  ;;  %v265_v60 = vshrl.u32 %v1661_v26, %v262_v45  ;;  %v79_v61 = vsel %vm73_vm3, %v76_v49, %v78_v53 }
  0x3b   :  { %v83_v62 = vsel %vm73_vm3, %v80_v51, %v82_v57  ;;  %v87_v63 = vsel %vm73_vm3, %v84_v52, %v86_v58  ;;  %v268_v3 = vshrl.u32 %v1662_v28, %v262_v45  ;;  %v270_v11 = vshll.u32 %v1662_v28, %v261_v21 }
  0x3c   :  { %v1733_v5 = vmul.u32.u64.low %v1720_v20, %v87_v63  ;;  %v1734_v6 = vmul.u32.u64.high %v1720_v20, %v87_v63, %v1733_v5  ;;  %v1737_v7 = vmul.u32.u64.low %v1720_v20, %v83_v62  ;;  %v1738_v8 = vmul.u32.u64.high %v1720_v20, %v83_v62, %v1737_v7 }
  0x3d   :  { %v266_v9 = vor.u32 %v265_v60, %v264_v48  ;;  %v269_v10 = vor.u32 %v268_v3, %v267_v56  ;;  %v271_v12 = vshrl.u32 %v1663_v30, %v262_v45  ;;  %v273_v13 = vshll.u32 %v1663_v30, %v261_v21 }
  0x3e   :  { %v274_v14 = vshrl.u32 %v1664_v32, %v262_v45  ;;  %v276_v15 = vshll.u32 %v1664_v32, %v261_v21  ;;  %v277_v16 = vshrl.u32 %v1665_v40, %v262_v45  ;;  %v95_v17 = vmul.u32 %v1720_v20, %v79_v61 }
  0x3f   :  { %v272_v18 = vor.u32 %v271_v12, %v270_v11  ;;  %vm279_vm6 = vcmp.lt.s32.totalorder %v1724_v34, 1  ;;  %vm280_vm7 = vcmp.lt.s32.totalorder %v1724_v34, 2  ;;  %vm97_vm8 = vc.u32 %v1734_v6, %v1737_v7 }
  0x40   :  { %v98_v19 = vadd.s32 1, %v1738_v8  ;;  %v275_v23 = vor.u32 %v274_v14, %v273_v13  ;;  %vm281_vm9 = vcmp.lt.s32.totalorder %v1724_v34, 3  ;;  %v278_v24 = vor.u32 %v277_v16, %v276_v15 }
  0x41   :  { %vm282_vm10 = vcmp.lt.s32.totalorder %v1724_v34, 4  ;;  %v283_v25 = vsel %vm279_vm6, %v263_v59, %v266_v9  ;;  %v287_v21 = vsel %vm279_vm6, %v266_v9, %v269_v10  ;;  %v291_v28 = vsel %vm279_vm6, %v269_v10, %v272_v18 }
  0x42   :  { %v99_v26 = vsel %vm97_vm8, %v98_v19, %v1738_v8  ;;  %v284_v20 = vsel %vm282_vm10, %v272_v18, 2102212464  ;;  %v288_v27 = vsel %vm282_vm10, %v275_v23, 920167782  ;;  %v292_v32 = vsel %vm282_vm10, %v278_v24, 1326507024 }
  0x43   :  { %v100_v29 = vadd.s32 %v99_v26, %v95_v17  ;;  %v285_v30 = vsel %vm281_vm9, %v269_v10, %v284_v20  ;;  %v289_v31 = vsel %vm281_vm9, %v272_v18, %v288_v27  ;;  %v293_v36 = vsel %vm281_vm9, %v275_v23, %v292_v32 }
  0x44   :  { %v286_v33 = vsel %vm280_vm7, %v283_v25, %v285_v30  ;;  %v290_v35 = vsel %vm280_vm7, %v287_v21, %v289_v31  ;;  %v294_v38 = vsel %vm280_vm7, %v291_v28, %v293_v36  ;;  %v96_v57 = vadd.s32 %v1737_v7, %v1734_v6 }
  0x45   :  { %v101_v37 = vadd.s32 536870912, %v100_v29  ;;  %v1755_v39 = vmul.u32.u64.low %v1722_v22, %v290_v35  ;;  %v1756_v40 = vmul.u32.u64.high %v1722_v22, %v290_v35, %v1755_v39  ;;  %v302_v44 = vmul.u32 %v1722_v22, %v286_v33 }
  0x46   :  { %v1759_v41 = vmul.u32.u64.low %v1722_v22, %v294_v38  ;;  %v1760_v42 = vmul.u32.u64.high %v1722_v22, %v294_v38, %v1759_v41  ;;  %vm132_vm5 = vweird.f32 %v1708_v0 }
  0x47   :  { %v102_v43 = vshrl.u32 %v101_v37, 30  ;;  %v305_v46 = vadd.s32 1, %v1756_v40 }
  0x48   :  { %vm304_vm11 = vc.u32 %v1760_v42, %v1755_v39  ;;  %v303_v13 = vadd.s32 %v1755_v39, %v1760_v42 }
  0x49   :  { %v103_v45 = vshll.u32 %v102_v43, 30  ;;  %v306_v34 = vsel %vm304_vm11, %v305_v46, %v1756_v40  ;;  %v126_v24 = vsub.s32 4, %v102_v43 }
  0x4a   :  { %v307_v48 = vadd.s32 %v306_v34, %v302_v44 }
  0x4b   :  { %v104_v47 = vsub.s32 %v100_v29, %v103_v45  ;;  %v127_v29 = vsel %vm42_vm14, %v126_v24, %v102_v43 }
  0x4c   :  { %v308_v50 = vadd.s32 536870912, %v307_v48  ;;  %v129_v32 = vsel %vm41_vm15, 0, %v127_v29 }
  0x4d   :  { %v106_v49 = vsub.s32 0, %v104_v47  ;;  %v236_v35 = vadd.s32 3, %v129_v32  ;;  %v133_v37 = vand.u32 3, %v129_v32 }
  0x4e   :  { %v309_v52 = vshrl.u32 %v308_v50, 30 }
  0x4f   :  { %v1333_v51 = vmin.u32 %v106_v49, %v104_v47  ;;  %v237_v41 = vand.u32 3, %v236_v35  ;;  %vm138_vm2 = vcmp.eq.s32.totalorder %v133_v37, 2  ;;  %vm135_vm3 = vcmp.eq.s32.totalorder %v133_v37, 0 }
  0x50   :  { %v310_v54 = vshll.u32 %v309_v52, 30  ;;  %v333_v31 = vsub.s32 4, %v309_v52  ;;  %vm134_vm4 = vcmp.lt.s32.totalorder %v133_v37, 2 }
  0x51   :  { %v108_v53 = vclz %v1333_v51  ;;  %vm239_vm6 = vcmp.eq.s32.totalorder %v237_v41, 0  ;;  %vm242_vm7 = vcmp.eq.s32.totalorder %v237_v41, 2  ;;  %vm238_vm8 = vcmp.lt.s32.totalorder %v237_v41, 2 }
  0x52   :  { %v311_v56 = vsub.s32 %v307_v48, %v310_v54  ;;  %v334_v36 = vsel %vm249_vm0, %v333_v31, %v309_v52 }
  0x53   :  { %v1334_v55 = vadd.s32 4294967294, %v108_v53  ;;  %v336_v40 = vsel %vm248_vm1, 0, %v334_v36  ;;  %v1667_v36 = vmov 1934713408  }
  0x54   :  { %v313_v58 = vsub.s32 0, %v311_v56  ;;  %v443_v45 = vadd.s32 3, %v336_v40  ;;  %v340_v48 = vand.u32 3, %v336_v40  ;;  %v521_v37 = vunpack.c.l.s4 %v1667_v36 }
  0x55   :  { %vm1335_vm12 = vcmp.lt.s32.totalorder %v1334_v55, 0 }
  0x56   :  { %v111_v22 = vsel %vm1335_vm12, 0, %v1334_v55  ;;  %v1341_v62 = vmin.u32 %v313_v58, %v311_v56  ;;  %v444_v49 = vand.u32 3, %v443_v45  ;;  %vm345_vm9 = vcmp.eq.s32.totalorder %v340_v48, 2 }
  0x57   :  { %v112_v59 = vsub.s32 32, %v111_v22  ;;  %v113_v60 = vshll.u32 %v104_v47, %v111_v22  ;;  %v116_v61 = vsub.s32 4294967266, %v111_v22  ;;  %vm342_vm11 = vcmp.eq.s32.totalorder %v340_v48, 0 }
  0x58   :  { %v315_v5 = vclz %v1341_v62  ;;  %vm449_vm10 = vcmp.eq.s32.totalorder %v444_v49, 2  ;;  %vm446_vm12 = vcmp.eq.s32.totalorder %v444_v49, 0 }
  0x59   :  { %v114_v63 = vshrl.u32 %v96_v57, %v112_v59  ;;  %v117_v3 = vadd.s32 127, %v116_v61 }
  0x5a   :  { %v1342_v10 = vadd.s32 4294967294, %v315_v5 }
  0x5b   :  { %v115_v8 = vor.u32 %v114_v63, %v113_v60  ;;  %v118_v9 = vshll.u32 %v117_v3, 23 }
  0x5c   :  { %vm1343_vm13 = vcmp.lt.s32.totalorder %v1342_v10, 0 }
  0x5d   :  { %v119_v11 = vor.u32 4788187, %v118_v9  ;;  %v122_v12 = vcvt.s32.f32 %v115_v8  ;;  %v318_v6 = vsel %vm1343_vm13, 0, %v1342_v10  ;;  %vm341_vm13 = vcmp.lt.s32.totalorder %v340_v48, 2 }
  0x5e   :  { %v319_v7 = vsub.s32 32, %v318_v6  ;;  %v320_v15 = vshll.u32 %v311_v56, %v318_v6  ;;  %v323_v16 = vsub.s32 4294967266, %v318_v6 }
  0x5f   :  { %v120_v14 = vand.u32 2147483647, %v119_v11 }
  0x60   :  { %v321_v18 = vshrl.u32 %v303_v13, %v319_v7  ;;  %v324_v19 = vadd.s32 127, %v323_v16 }
  0x61   :  { %v123_v17 = vmul.f32 %v122_v12, %v120_v14  ;;  %v490_v14 = vlaneseq }
  0x62   :  { %v322_v25 = vor.u32 %v321_v18, %v320_v15  ;;  %v325_v21 = vshll.u32 %v324_v19, 23  ;;  %v1666_v15 = vmov 1983009808  }
  0x63   :  { %v124_v23 = vxor.u32 2147483648, %v123_v17  ;;  %v491_v19 = vshrl.u32 %v490_v14, 7 }
  0x64   :  { %v326_v27 = vor.u32 4788187, %v325_v21  ;;  %v329_v28 = vcvt.s32.f32 %v322_v25 }
  0x65   :  { %v125_v26 = vsel %vm42_vm14, %v124_v23, %v123_v17  ;;  %vm445_vm14 = vcmp.lt.s32.totalorder %v444_v49, 2 }
  0x66   :  { %v128_v20 = vsel %vm41_vm15, %v1708_v0, %v125_v26  ;;  %v327_v30 = vand.u32 2147483647, %v326_v27  ;;  %vm339_vm15 = vweird.f32 %v1710_v1  ;;  %v488_v0 = vunpack.c.l.s4 %v1666_v15 }
  0x67   :  { %1600 = vcosq.f32 %v128_v20 }
  0x68   :  { %1602 = vsinq.f32 %v128_v20  ;;  %v330_v33 = vmul.f32 %v329_v28, %v327_v30  ;;  %v489_v21 = vunpack.c.0.s8 %v488_v0 }
  0x6a   :  { %v331_v2 = vxor.u32 2147483648, %v330_v33  ;;  %v492_v40 = vsub.s32 %v489_v21, %v491_v19 }
  0x6c   :  { %v332_v38 = vsel %vm249_vm0, %v331_v2, %v330_v33  ;;  %vm683_vm0 = vcmask 64512  }
  0x6d   :  { %v335_v39 = vsel %vm248_vm1, %v1710_v1, %v332_v38  ;;  %vm1261_vm1 = vcmask 261120  }
  0x6e   :  { %1604 = vcosq.f32 %v335_v39 }
  0x6f   :  { %1606 = vsinq.f32 %v335_v39 }
  0x71   :  { %v1601_v42 = vpop.eup %1600 }
  0x72   :  { %v1603_v43 = vpop.eup %1602  ;;  %v139_v44 = vxor.u32 2147483648, %v1601_v42 }
  0x73   :  { %v136_v46 = vxor.u32 2147483648, %v1603_v43 }
  0x74   :  { %v140_v4 = vsel %vm138_vm2, %v139_v44, %v1603_v43  ;;  %v244_v52 = vsel %vm242_vm7, %v139_v44, %v1603_v43  ;;  %v1668_v44 = vmov 1.0  }
  0x75   :  { %v137_v47 = vsel %vm135_vm3, %v1601_v42, %v136_v46  ;;  %v241_v51 = vsel %vm239_vm6, %v1601_v42, %v136_v46 }
  0x76   :  { %v141_v34 = vsel %vm134_vm4, %v137_v47, %v140_v4  ;;  %v245_v55 = vsel %vm238_vm8, %v241_v51, %v244_v52  ;;  %v522_v47 = vunpack.c.0.s8 %v521_v37 }
  0x77   :  { %v1779_v50 = vsel %vm132_vm5, nan, %v141_v34  ;;  %v246_v59 = vsel %vm132_vm5, nan, %v245_v55 }
  0x78   :  { %v454_v53 = vmul.f32 2.0, %v1779_v50  ;;  %v1605_v54 = vpop.eup %1604 }
  0x79   :  { %v1607_v56 = vpop.eup %1606  ;;  %v346_v57 = vxor.u32 2147483648, %v1605_v54 }
  0x7a   :  { %v343_v22 = vxor.u32 2147483648, %v1607_v56  ;;  %v455_v58 = vmul.f32 %v454_v53, %v1779_v50  ;;  %v457_v11 = vmul.f32 %v454_v53, %v246_v59 }
  0x7b   :  { %v347_v60 = vsel %vm345_vm9, %v346_v57, %v1607_v56  ;;  %v451_v61 = vsel %vm449_vm10, %v346_v57, %v1607_v56 }
  0x7c   :  { %v344_v62 = vsel %vm342_vm11, %v1605_v54, %v343_v22  ;;  %v448_v63 = vsel %vm446_vm12, %v1605_v54, %v343_v22  ;;  %v1348_v10 = vadd.f32 -1.0, %v455_v58  ;;  %v460_v17 = vmul.f32 %v457_v11, %v454_v53 }
  0x7d   :  { %v348_v3 = vsel %vm341_vm13, %v344_v62, %v347_v60  ;;  %v452_v5 = vsel %vm445_vm14, %v448_v63, %v451_v61 }
  0x7e   :  { %v349_v8 = vsel %vm339_vm15, nan, %v348_v3  ;;  %v453_v9 = vsel %vm339_vm15, nan, %v452_v5  ;;  %v458_v16 = vmul.f32 %v1348_v10, %v454_v53  ;;  %v461_v20 = vsub.f32 %v460_v17, %v246_v59 }
  0x7f   :  { %v462_v12 = vmul.f32 -1.0, %v453_v9  ;;  %v475_v13 = vmul.f32 3.0, %v349_v8  ;;  %v471_v7 = vmul.f32 5.0, %v349_v8  ;;  %v467_v24 = vmul.f32 7.0, %v349_v8 }
  0x80   :  { %v459_v26 = vsub.f32 %v458_v16, %v1779_v50  ;;  %v479_v31 = vmul.f32 0.48860252, %v349_v8  ;;  %v525_v53 = vsub.s32 %v522_v47, %v491_v19 }
  0x81   :  { %v463_v6 = vmul.f32 -3.0, %v462_v12  ;;  %v476_v1 = vmul.f32 %v475_v13, %v462_v12 }
  0x83   :  { %v464_v18 = vmul.f32 %v463_v6, %v453_v9  ;;  %v477_v27 = vmul.f32 %v476_v1, %v246_v59  ;;  %v480_v28 = vmul.f32 %v476_v1, %v1779_v50  ;;  %v554_v59 = vld [vmem:[#allocation4] sm:$0xff] }
  0x84   :  { %1478 = vmatprep.subr.mxu0 %v554_v59  ;;  %1576 = vmatprep.subr.mxu1 %v554_v59 }
  0x85   :  { %v465_v23 = vmul.f32 -5.0, %v464_v18  ;;  %v472_v25 = vmul.f32 %v471_v7, %v464_v18  ;;  %v478_v38 = vmul.f32 -0.3641828, %v477_v27  ;;  %v481_v39 = vmul.f32 -0.3641828, %v480_v28  ;;  %1479 = vmatpush3.msra.mxu0 %v554_v59  ;;  %1577 = vmatpush3.msra.mxu1 %v554_v59 }
  0x87   :  { %v466_v29 = vmul.f32 %v465_v23, %v453_v9  ;;  %v473_v30 = vmul.f32 %v472_v25, %v457_v11  ;;  %v482_v32 = vmul.f32 %v1348_v10, %v472_v25 }
  0x89   :  { %v468_v33 = vmul.f32 %v467_v24, %v466_v29  ;;  %v474_v35 = vmul.f32 0.09635372, %v473_v30  ;;  %v483_v2 = vmul.f32 0.09635372, %v482_v32 }
  0x8b   :  { %v469_v41 = vmul.f32 %v468_v33, %v461_v20  ;;  %v484_v42 = vmul.f32 %v468_v33, %v459_v26  ;;  %v494_v43 = vcombine.low %v474_v35, %v479_v31  ;;  %v510_v45 = vcombine.low %v483_v2, %v1668_v44 }
  0x8d   :  { %v470_v46 = vmul.f32 -0.016858388, %v469_v41  ;;  %v485_v4 = vmul.f32 -0.016858388, %v484_v42  ;;  %v501_v48 = vrot.slane %v494_v43, %v492_v40  ;;  %v517_v50 = vrot.slane %v510_v45, %v492_v40 }
  0x8f   :  { %v486_v34 = vcombine.low %v470_v46, %v478_v38  ;;  %v502_v49 = vcombine.low %v481_v39, %v485_v4 }
  0x91   :  { %v493_v51 = vrot.slane %v486_v34, %v492_v40  ;;  %v509_v52 = vrot.slane %v502_v49, %v492_v40 }
  0x93   :  { %v518_v54 = vcombine.low %v493_v51, %v501_v48  ;;  %v534_v55 = vcombine.low %v509_v52, %v517_v50  ;;  %v519_v60 = vcombine.high %v493_v51, %v501_v48  ;;  %v535_v61 = vcombine.high %v509_v52, %v517_v50 }
  0x95   :  { %v526_v56 = vrot.slane %v518_v54, %v525_v53  ;;  %v542_v57 = vrot.slane %v534_v55, %v525_v53  ;;  %v533_v62 = vrot.slane %v519_v60, %v525_v53  ;;  %v549_v63 = vrot.slane %v535_v61, %v525_v53 }
  0x97   :  { %v550_v22 = vcombine.low %v526_v56, %v542_v57  ;;  %v551_v58 = vcombine.high %v526_v56, %v542_v57  ;;  %v552_v3 = vcombine.low %v533_v62, %v549_v63  ;;  %v553_v5 = vcombine.high %v533_v62, %v549_v63 }
  0x99   :  { %555 = vxpose.xlu0.b32.start.end [1/1] (short) %v550_v22, 128  ;;  %587 = vxpose.xlu1.b32.start.end [1/1] (short) %v551_v58, 128 }
  0xd6   :  { %619 = vxpose.xlu0.b32.start.end [1/1] (short) %v552_v3, 128  ;;  %651 = vxpose.xlu1.b32.start.end [1/1] (short) %v553_v5, 128 }
 0x119   :  { %v571_v8 = vpop.trf.xlu0  ;;  %v603_v9 = vpop.trf.xlu1 }
 0x11a   :  { %1480 = vmatprep.mubr.msk.f32.mxu0 %vm683_vm0, %v571_v8 }
 0x11d   :  { %v572_v10 = vpop.trf.xlu0  ;;  %v604_v11 = vpop.trf.xlu1 }
 0x11e   :  { %1481 = vmatmul.mubr.msk.f32.vlgmr.msra.gmra.mrb[0].mxu0 %vm683_vm0, %v572_v10 }
 0x121   :  { %v573_v12 = vpop.trf.xlu0  ;;  %v605_v13 = vpop.trf.xlu1 }
 0x122   :  { %1483 = vmatprep.mubr.msk.f32.mxu0 %vm683_vm0, %v573_v12 }
 0x125   :  { %v574_v14 = vpop.trf.xlu0  ;;  %v606_v6 = vpop.trf.xlu1 }
 0x126   :  { %1484 = vmatmul.mubr.msk.f32.gmra.mrb[2].mxu0 %vm683_vm0, %v574_v14 }
 0x129   :  { %v575_v7 = vpop.trf.xlu0  ;;  %v607_v15 = vpop.trf.xlu1 }
 0x12a   :  { %1486 = vmatprep.mubr.msk.f32.mxu0 %vm683_vm0, %v575_v7 }
 0x12d   :  { %v576_v0 = vpop.trf.xlu0  ;;  %v608_v16 = vpop.trf.xlu1 }
 0x12e   :  { %1487 = vmatmul.mubr.msk.f32.gmra.mrb[4].mxu0 %vm683_vm0, %v576_v0 }
 0x131   :  { %v577_v17 = vpop.trf.xlu0  ;;  %v609_v1 = vpop.trf.xlu1 }
 0x132   :  { %1489 = vmatprep.mubr.msk.f32.mxu0 %vm683_vm0, %v577_v17 }
 0x135   :  { %v578_v18 = vpop.trf.xlu0  ;;  %v610_v19 = vpop.trf.xlu1 }
 0x136   :  { %1490 = vmatmul.mubr.msk.f32.gmra.mrb[6].mxu0 %vm683_vm0, %v578_v18 }
 0x139   :  { %v579_v23 = vpop.trf.xlu0  ;;  %v611_v24 = vpop.trf.xlu1 }
 0x13a   :  { %1492 = vmatprep.mubr.msk.f32.mxu0 %vm683_vm0, %v579_v23 }
 0x13d   :  { %v580_v25 = vpop.trf.xlu0  ;;  %v612_v21 = vpop.trf.xlu1 }
 0x13e   :  { %1493 = vmatmul.mubr.msk.f32.gmra.mrb[8].mxu0 %vm683_vm0, %v580_v25 }
 0x141   :  { %v581_v26 = vpop.trf.xlu0  ;;  %v613_v20 = vpop.trf.xlu1 }
 0x142   :  { %1495 = vmatprep.mubr.msk.f32.mxu0 %vm683_vm0, %v581_v26 }
 0x145   :  { %v582_v27 = vpop.trf.xlu0  ;;  %v614_v28 = vpop.trf.xlu1 }
 0x146   :  { %1496 = vmatmul.mubr.msk.f32.gmra.mrb[10].mxu0 %vm683_vm0, %v582_v27 }
 0x149   :  { %v583_v29 = vpop.trf.xlu0  ;;  %v615_v30 = vpop.trf.xlu1 }
 0x14a   :  { %1498 = vmatprep.mubr.msk.f32.mxu0 %vm683_vm0, %v583_v29 }
 0x14d   :  { %v584_v31 = vpop.trf.xlu0  ;;  %v616_v32 = vpop.trf.xlu1 }
 0x14e   :  { %1499 = vmatmul.mubr.msk.f32.gmra.mrb[12].mxu0 %vm683_vm0, %v584_v31 }
 0x151   :  { %v585_v33 = vpop.trf.xlu0  ;;  %v617_v35 = vpop.trf.xlu1 }
 0x152   :  { %1501 = vmatprep.mubr.msk.f32.mxu0 %vm683_vm0, %v585_v33 }
 0x155   :  { %v586_v2 = vpop.trf.xlu0  ;;  %v618_v36 = vpop.trf.xlu1 }
 0x156   :  { %1502 = vmatmul.mubr.msk.f32.gmra.mrb[14].mxu0 %vm683_vm0, %v586_v2 }
 0x157   :  { %1504 = vmatprep.mubr.msk.f32.mxu0 %vm683_vm0, %v603_v9 }
 0x159   :  { %v635_v37 = vpop.trf.xlu0  ;;  %v667_v38 = vpop.trf.xlu1 }
 0x15a   :  { %1505 = vmatmul.mubr.msk.f32.gmra.mrb[16].mxu0 %vm683_vm0, %v604_v11  ;;  %1528 = vmatprep.mubr.msk.f32.mxu1 %vm683_vm0, %v635_v37 }
 0x15b   :  { %1507 = vmatprep.mubr.msk.f32.mxu0 %vm683_vm0, %v605_v13 }
 0x15d   :  { %v636_v39 = vpop.trf.xlu0  ;;  %v668_v40 = vpop.trf.xlu1 }
 0x15e   :  { %1508 = vmatmul.mubr.msk.f32.gmra.mrb[18].mxu0 %vm683_vm0, %v606_v6  ;;  %1529 = vmatmul.mubr.msk.f32.vlgmr.msra.gmra.mrb[0].mxu1 %vm683_vm0, %v636_v39 }
 0x15f   :  { %1510 = vmatprep.mubr.msk.f32.mxu0 %vm683_vm0, %v607_v15 }
 0x161   :  { %v637_v41 = vpop.trf.xlu0  ;;  %v669_v43 = vpop.trf.xlu1 }
 0x162   :  { %1511 = vmatmul.mubr.msk.f32.gmra.mrb[20].mxu0 %vm683_vm0, %v608_v16  ;;  %1531 = vmatprep.mubr.msk.f32.mxu1 %vm683_vm0, %v637_v41 }
 0x163   :  { %1513 = vmatprep.mubr.msk.f32.mxu0 %vm683_vm0, %v609_v1 }
 0x165   :  { %v638_v42 = vpop.trf.xlu0  ;;  %v670_v45 = vpop.trf.xlu1 }
 0x166   :  { %1514 = vmatmul.mubr.msk.f32.gmra.mrb[22].mxu0 %vm683_vm0, %v610_v19  ;;  %1532 = vmatmul.mubr.msk.f32.gmra.mrb[2].mxu1 %vm683_vm0, %v638_v42 }
 0x167   :  { %1516 = vmatprep.mubr.msk.f32.mxu0 %vm683_vm0, %v611_v24 }
 0x169   :  { %v639_v44 = vpop.trf.xlu0  ;;  %v671_v47 = vpop.trf.xlu1 }
 0x16a   :  { %1517 = vmatmul.mubr.msk.f32.gmra.mrb[24].mxu0 %vm683_vm0, %v612_v21  ;;  %1534 = vmatprep.mubr.msk.f32.mxu1 %vm683_vm0, %v639_v44 }
 0x16b   :  { %1519 = vmatprep.mubr.msk.f32.mxu0 %vm683_vm0, %v613_v20 }
 0x16d   :  { %v640_v46 = vpop.trf.xlu0  ;;  %v672_v48 = vpop.trf.xlu1 }
 0x16e   :  { %1520 = vmatmul.mubr.msk.f32.gmra.mrb[26].mxu0 %vm683_vm0, %v614_v28  ;;  %1535 = vmatmul.mubr.msk.f32.gmra.mrb[4].mxu1 %vm683_vm0, %v640_v46 }
 0x16f   :  { %1522 = vmatprep.mubr.msk.f32.mxu0 %vm683_vm0, %v615_v30 }
 0x171   :  { %v641_v4 = vpop.trf.xlu0  ;;  %v673_v51 = vpop.trf.xlu1 }
 0x172   :  { %1523 = vmatmul.mubr.msk.f32.gmra.mrb[28].mxu0 %vm683_vm0, %v616_v32  ;;  %1537 = vmatprep.mubr.msk.f32.mxu1 %vm683_vm0, %v641_v4 }
 0x173   :  { %1525 = vmatprep.mubr.msk.f32.mxu0 %vm683_vm0, %v617_v35 }
 0x175   :  { %v642_v34 = vpop.trf.xlu0  ;;  %v674_v53 = vpop.trf.xlu1 }
 0x176   :  { %1526 = vmatmul.mubr.msk.f32.gmra.mrb[30].mxu0 %vm683_vm0, %v618_v36  ;;  %1538 = vmatmul.mubr.msk.f32.gmra.mrb[6].mxu1 %vm683_vm0, %v642_v34 }
 0x179   :  { %v643_v49 = vpop.trf.xlu0  ;;  %v675_v56 = vpop.trf.xlu1 }
 0x17a   :  { %1540 = vmatprep.mubr.msk.f32.mxu1 %vm683_vm0, %v643_v49 }
 0x17d   :  { %v644_v50 = vpop.trf.xlu0  ;;  %v676_v22 = vpop.trf.xlu1 }
 0x17e   :  { %1541 = vmatmul.mubr.msk.f32.gmra.mrb[8].mxu1 %vm683_vm0, %v644_v50 }
 0x181   :  { %v645_v52 = vpop.trf.xlu0  ;;  %v677_v60 = vpop.trf.xlu1 }
 0x182   :  { %1543 = vmatprep.mubr.msk.f32.mxu1 %vm683_vm0, %v645_v52 }
 0x185   :  { %v646_v54 = vpop.trf.xlu0  ;;  %v678_v61 = vpop.trf.xlu1 }
 0x186   :  { %1544 = vmatmul.mubr.msk.f32.gmra.mrb[10].mxu1 %vm683_vm0, %v646_v54 }
 0x189   :  { %v647_v55 = vpop.trf.xlu0  ;;  %v679_v62 = vpop.trf.xlu1 }
 0x18a   :  { %1546 = vmatprep.mubr.msk.f32.mxu1 %vm683_vm0, %v647_v55 }
 0x18d   :  { %v648_v57 = vpop.trf.xlu0  ;;  %v680_v63 = vpop.trf.xlu1 }
 0x18e   :  { %1547 = vmatmul.mubr.msk.f32.gmra.mrb[12].mxu1 %vm683_vm0, %v648_v57 }
 0x191   :  { %v649_v58 = vpop.trf.xlu0  ;;  %v681_v3 = vpop.trf.xlu1 }
 0x192   :  { %1549 = vmatprep.mubr.msk.f32.mxu1 %vm683_vm0, %v649_v58 }
 0x195   :  { %v650_v59 = vpop.trf.xlu0  ;;  %v682_v5 = vpop.trf.xlu1 }
 0x196   :  { %1550 = vmatmul.mubr.msk.f32.gmra.mrb[14].mxu1 %vm683_vm0, %v650_v59 }
 0x197   :  { %1552 = vmatprep.mubr.msk.f32.mxu1 %vm683_vm0, %v667_v38 }
 0x19a   :  { %1553 = vmatmul.mubr.msk.f32.gmra.mrb[16].mxu1 %vm683_vm0, %v668_v40 }
 0x19b   :  { %1555 = vmatprep.mubr.msk.f32.mxu1 %vm683_vm0, %v669_v43 }
 0x19e   :  { %1556 = vmatmul.mubr.msk.f32.gmra.mrb[18].mxu1 %vm683_vm0, %v670_v45 }
 0x19f   :  { %1558 = vmatprep.mubr.msk.f32.mxu1 %vm683_vm0, %v671_v47 }
 0x1a2   :  { %1559 = vmatmul.mubr.msk.f32.gmra.mrb[20].mxu1 %vm683_vm0, %v672_v48 }
 0x1a3   :  { %1561 = vmatprep.mubr.msk.f32.mxu1 %vm683_vm0, %v673_v51 }
 0x1a6   :  { %1562 = vmatmul.mubr.msk.f32.gmra.mrb[22].mxu1 %vm683_vm0, %v674_v53 }
 0x1a7   :  { %1564 = vmatprep.mubr.msk.f32.mxu1 %vm683_vm0, %v675_v56 }
 0x1aa   :  { %1565 = vmatmul.mubr.msk.f32.gmra.mrb[24].mxu1 %vm683_vm0, %v676_v22 }
 0x1ab   :  { %1567 = vmatprep.mubr.msk.f32.mxu1 %vm683_vm0, %v677_v60 }
 0x1ae   :  { %1568 = vmatmul.mubr.msk.f32.gmra.mrb[26].mxu1 %vm683_vm0, %v678_v61 }
 0x1af   :  { %1570 = vmatprep.mubr.msk.f32.mxu1 %vm683_vm0, %v679_v62 }
 0x1b2   :  { %1571 = vmatmul.mubr.msk.f32.gmra.mrb[28].mxu1 %vm683_vm0, %v680_v63 }
 0x1b3   :  { %1573 = vmatprep.mubr.msk.f32.mxu1 %vm683_vm0, %v681_v3 }
 0x1b6   :  { %1574 = vmatmul.mubr.msk.f32.gmra.mrb[30].mxu1 %vm683_vm0, %v682_v5 }
 0x1f1   :  { %v1482_v8 = vpop.f32.mrb[0].mxu0 }
 0x1f2   :  { %1263 = vst.msk [vmem:[%s2110_s2 + $0x8] sm:$0xff] %vm1261_vm1, %v1482_v8  ;;  %v942_v9 = vpop.f32.mrb[1].mxu0 }
 0x1f3   :  { %1262 = vst.msk [vmem:[%s2110_s2] sm:$0xff] %vm1261_vm1, %v942_v9 }
 0x1f9   :  { %v1485_v10 = vpop.f32.mrb[2].mxu0 }
 0x1fa   :  { %1265 = vst.msk [vmem:[%s2110_s2 + $0x18] sm:$0xff] %vm1261_vm1, %v1485_v10  ;;  %v952_v11 = vpop.f32.mrb[3].mxu0 }
 0x1fb   :  { %1264 = vst.msk [vmem:[%s2110_s2 + $0x10] sm:$0xff] %vm1261_vm1, %v952_v11 }
 0x201   :  { %v1488_v12 = vpop.f32.mrb[4].mxu0 }
 0x202   :  { %1267 = vst.msk [vmem:[%s2110_s2 + $0x28] sm:$0xff] %vm1261_vm1, %v1488_v12  ;;  %v962_v13 = vpop.f32.mrb[5].mxu0 }
 0x203   :  { %1266 = vst.msk [vmem:[%s2110_s2 + $0x20] sm:$0xff] %vm1261_vm1, %v962_v13 }
 0x209   :  { %v1491_v14 = vpop.f32.mrb[6].mxu0 }
 0x20a   :  { %1269 = vst.msk [vmem:[%s2110_s2 + $0x38] sm:$0xff] %vm1261_vm1, %v1491_v14  ;;  %v972_v6 = vpop.f32.mrb[7].mxu0 }
 0x20b   :  { %1268 = vst.msk [vmem:[%s2110_s2 + $0x30] sm:$0xff] %vm1261_vm1, %v972_v6 }
 0x211   :  { %v1494_v7 = vpop.f32.mrb[8].mxu0 }
 0x212   :  { %1271 = vst.msk [vmem:[%s2110_s2 + $0x48] sm:$0xff] %vm1261_vm1, %v1494_v7  ;;  %v982_v15 = vpop.f32.mrb[9].mxu0 }
 0x213   :  { %1270 = vst.msk [vmem:[%s2110_s2 + $0x40] sm:$0xff] %vm1261_vm1, %v982_v15 }
 0x219   :  { %v1497_v0 = vpop.f32.mrb[10].mxu0 }
 0x21a   :  { %1273 = vst.msk [vmem:[%s2110_s2 + $0x58] sm:$0xff] %vm1261_vm1, %v1497_v0  ;;  %v992_v16 = vpop.f32.mrb[11].mxu0 }
 0x21b   :  { %1272 = vst.msk [vmem:[%s2110_s2 + $0x50] sm:$0xff] %vm1261_vm1, %v992_v16 }
 0x221   :  { %v1500_v17 = vpop.f32.mrb[12].mxu0 }
 0x222   :  { %1275 = vst.msk [vmem:[%s2110_s2 + $0x68] sm:$0xff] %vm1261_vm1, %v1500_v17  ;;  %v1002_v1 = vpop.f32.mrb[13].mxu0 }
 0x223   :  { %1274 = vst.msk [vmem:[%s2110_s2 + $0x60] sm:$0xff] %vm1261_vm1, %v1002_v1 }
 0x229   :  { %v1503_v18 = vpop.f32.mrb[14].mxu0 }
 0x22a   :  { %1277 = vst.msk [vmem:[%s2110_s2 + $0x78] sm:$0xff] %vm1261_vm1, %v1503_v18  ;;  %v1012_v19 = vpop.f32.mrb[15].mxu0 }
 0x22b   :  { %1276 = vst.msk [vmem:[%s2110_s2 + $0x70] sm:$0xff] %vm1261_vm1, %v1012_v19 }
 0x22d   :  { %v1506_v23 = vpop.f32.mrb[16].mxu0 }
 0x22e   :  { %1279 = vst.msk [vmem:[%s2110_s2 + $0x88] sm:$0xff] %vm1261_vm1, %v1506_v23  ;;  %v1022_v24 = vpop.f32.mrb[17].mxu0 }
 0x22f   :  { %1278 = vst.msk [vmem:[%s2110_s2 + $0x80] sm:$0xff] %vm1261_vm1, %v1022_v24 }
 0x231   :  { %v1509_v25 = vpop.f32.mrb[18].mxu0  ;;  %v1530_v21 = vpop.f32.mrb[0].mxu1 }
 0x232   :  { %1281 = vst.msk [vmem:[%s2110_s2 + $0x98] sm:$0xff] %vm1261_vm1, %v1509_v25  ;;  %1295 = vst.msk [vmem:[%s2110_s2 + $0x108] sm:$0xff] %vm1261_vm1, %v1530_v21  ;;  %v1032_v26 = vpop.f32.mrb[19].mxu0  ;;  %v1102_v20 = vpop.f32.mrb[1].mxu1 }
 0x233   :  { %1280 = vst.msk [vmem:[%s2110_s2 + $0x90] sm:$0xff] %vm1261_vm1, %v1032_v26  ;;  %1294 = vst.msk [vmem:[%s2110_s2 + $0x100] sm:$0xff] %vm1261_vm1, %v1102_v20 }
 0x235   :  { %v1512_v27 = vpop.f32.mrb[20].mxu0 }
 0x236   :  { %1283 = vst.msk [vmem:[%s2110_s2 + $0xa8] sm:$0xff] %vm1261_vm1, %v1512_v27  ;;  %v1042_v28 = vpop.f32.mrb[21].mxu0 }
 0x237   :  { %1282 = vst.msk [vmem:[%s2110_s2 + $0xa0] sm:$0xff] %vm1261_vm1, %v1042_v28 }
 0x239   :  { %v1515_v29 = vpop.f32.mrb[22].mxu0  ;;  %v1533_v30 = vpop.f32.mrb[2].mxu1 }
 0x23a   :  { %1285 = vst.msk [vmem:[%s2110_s2 + $0xb8] sm:$0xff] %vm1261_vm1, %v1515_v29  ;;  %1297 = vst.msk [vmem:[%s2110_s2 + $0x118] sm:$0xff] %vm1261_vm1, %v1533_v30  ;;  %v1052_v31 = vpop.f32.mrb[23].mxu0  ;;  %v1112_v32 = vpop.f32.mrb[3].mxu1 }
 0x23b   :  { %1284 = vst.msk [vmem:[%s2110_s2 + $0xb0] sm:$0xff] %vm1261_vm1, %v1052_v31  ;;  %1296 = vst.msk [vmem:[%s2110_s2 + $0x110] sm:$0xff] %vm1261_vm1, %v1112_v32 }
 0x23d   :  { %v1518_v33 = vpop.f32.mrb[24].mxu0 }
 0x23e   :  { %1287 = vst.msk [vmem:[%s2110_s2 + $0xc8] sm:$0xff] %vm1261_vm1, %v1518_v33  ;;  %v1062_v35 = vpop.f32.mrb[25].mxu0 }
 0x23f   :  { %1286 = vst.msk [vmem:[%s2110_s2 + $0xc0] sm:$0xff] %vm1261_vm1, %v1062_v35 }
 0x241   :  { %v1521_v2 = vpop.f32.mrb[26].mxu0  ;;  %v1536_v36 = vpop.f32.mrb[4].mxu1 }
 0x242   :  { %1289 = vst.msk [vmem:[%s2110_s2 + $0xd8] sm:$0xff] %vm1261_vm1, %v1521_v2  ;;  %1299 = vst.msk [vmem:[%s2110_s2 + $0x128] sm:$0xff] %vm1261_vm1, %v1536_v36  ;;  %v1072_v37 = vpop.f32.mrb[27].mxu0  ;;  %v1122_v38 = vpop.f32.mrb[5].mxu1 }
 0x243   :  { %1288 = vst.msk [vmem:[%s2110_s2 + $0xd0] sm:$0xff] %vm1261_vm1, %v1072_v37  ;;  %1298 = vst.msk [vmem:[%s2110_s2 + $0x120] sm:$0xff] %vm1261_vm1, %v1122_v38 }
 0x245   :  { %v1524_v39 = vpop.f32.mrb[28].mxu0 }
 0x246   :  { %1291 = vst.msk [vmem:[%s2110_s2 + $0xe8] sm:$0xff] %vm1261_vm1, %v1524_v39  ;;  %v1082_v40 = vpop.f32.mrb[29].mxu0 }
 0x247   :  { %1290 = vst.msk [vmem:[%s2110_s2 + $0xe0] sm:$0xff] %vm1261_vm1, %v1082_v40 }
 0x249   :  { %v1527_v41 = vpop.f32.mrb[30].mxu0  ;;  %v1539_v42 = vpop.f32.mrb[6].mxu1 }
 0x24a   :  { %1293 = vst.msk [vmem:[%s2110_s2 + $0xf8] sm:$0xff] %vm1261_vm1, %v1527_v41  ;;  %1301 = vst.msk [vmem:[%s2110_s2 + $0x138] sm:$0xff] %vm1261_vm1, %v1539_v42  ;;  %v1092_v43 = vpop.f32.mrb[31].mxu0  ;;  %v1132_v44 = vpop.f32.mrb[7].mxu1 }
 0x24b   :  { %1292 = vst.msk [vmem:[%s2110_s2 + $0xf0] sm:$0xff] %vm1261_vm1, %v1092_v43  ;;  %1300 = vst.msk [vmem:[%s2110_s2 + $0x130] sm:$0xff] %vm1261_vm1, %v1132_v44 }
 0x251   :  { %v1542_v45 = vpop.f32.mrb[8].mxu1 }
 0x252   :  { %1303 = vst.msk [vmem:[%s2110_s2 + $0x148] sm:$0xff] %vm1261_vm1, %v1542_v45  ;;  %v1142_v46 = vpop.f32.mrb[9].mxu1 }
 0x253   :  { %1302 = vst.msk [vmem:[%s2110_s2 + $0x140] sm:$0xff] %vm1261_vm1, %v1142_v46 }
 0x259   :  { %v1545_v4 = vpop.f32.mrb[10].mxu1 }
 0x25a   :  { %1305 = vst.msk [vmem:[%s2110_s2 + $0x158] sm:$0xff] %vm1261_vm1, %v1545_v4  ;;  %v1152_v47 = vpop.f32.mrb[11].mxu1 }
 0x25b   :  { %1304 = vst.msk [vmem:[%s2110_s2 + $0x150] sm:$0xff] %vm1261_vm1, %v1152_v47 }
 0x261   :  { %v1548_v34 = vpop.f32.mrb[12].mxu1 }
 0x262   :  { %1307 = vst.msk [vmem:[%s2110_s2 + $0x168] sm:$0xff] %vm1261_vm1, %v1548_v34  ;;  %v1162_v48 = vpop.f32.mrb[13].mxu1 }
 0x263   :  { %1306 = vst.msk [vmem:[%s2110_s2 + $0x160] sm:$0xff] %vm1261_vm1, %v1162_v48 }
 0x269   :  { %v1551_v49 = vpop.f32.mrb[14].mxu1 }
 0x26a   :  { %1309 = vst.msk [vmem:[%s2110_s2 + $0x178] sm:$0xff] %vm1261_vm1, %v1551_v49  ;;  %v1172_v50 = vpop.f32.mrb[15].mxu1 }
 0x26b   :  { %1308 = vst.msk [vmem:[%s2110_s2 + $0x170] sm:$0xff] %vm1261_vm1, %v1172_v50 }
 0x26d   :  { %v1554_v51 = vpop.f32.mrb[16].mxu1 }
 0x26e   :  { %1311 = vst.msk [vmem:[%s2110_s2 + $0x188] sm:$0xff] %vm1261_vm1, %v1554_v51  ;;  %v1182_v52 = vpop.f32.mrb[17].mxu1 }
 0x26f   :  { %1310 = vst.msk [vmem:[%s2110_s2 + $0x180] sm:$0xff] %vm1261_vm1, %v1182_v52 }
 0x271   :  { %v1557_v53 = vpop.f32.mrb[18].mxu1 }
 0x272   :  { %1313 = vst.msk [vmem:[%s2110_s2 + $0x198] sm:$0xff] %vm1261_vm1, %v1557_v53  ;;  %v1192_v54 = vpop.f32.mrb[19].mxu1 }
 0x273   :  { %1312 = vst.msk [vmem:[%s2110_s2 + $0x190] sm:$0xff] %vm1261_vm1, %v1192_v54 }
 0x275   :  { %v1560_v55 = vpop.f32.mrb[20].mxu1 }
 0x276   :  { %1315 = vst.msk [vmem:[%s2110_s2 + $0x1a8] sm:$0xff] %vm1261_vm1, %v1560_v55  ;;  %v1202_v56 = vpop.f32.mrb[21].mxu1 }
 0x277   :  { %1314 = vst.msk [vmem:[%s2110_s2 + $0x1a0] sm:$0xff] %vm1261_vm1, %v1202_v56 }
 0x279   :  { %v1563_v57 = vpop.f32.mrb[22].mxu1 }
 0x27a   :  { %1317 = vst.msk [vmem:[%s2110_s2 + $0x1b8] sm:$0xff] %vm1261_vm1, %v1563_v57  ;;  %v1212_v22 = vpop.f32.mrb[23].mxu1 }
 0x27b   :  { %1316 = vst.msk [vmem:[%s2110_s2 + $0x1b0] sm:$0xff] %vm1261_vm1, %v1212_v22 }
 0x27d   :  { %v1566_v58 = vpop.f32.mrb[24].mxu1 }
 0x27e   :  { %1319 = vst.msk [vmem:[%s2110_s2 + $0x1c8] sm:$0xff] %vm1261_vm1, %v1566_v58  ;;  %v1222_v59 = vpop.f32.mrb[25].mxu1 }
 0x27f   :  { %1318 = vst.msk [vmem:[%s2110_s2 + $0x1c0] sm:$0xff] %vm1261_vm1, %v1222_v59 }
 0x281   :  { %v1569_v60 = vpop.f32.mrb[26].mxu1 }
 0x282   :  { %1321 = vst.msk [vmem:[%s2110_s2 + $0x1d8] sm:$0xff] %vm1261_vm1, %v1569_v60  ;;  %v1232_v61 = vpop.f32.mrb[27].mxu1 }
 0x283   :  { %1320 = vst.msk [vmem:[%s2110_s2 + $0x1d0] sm:$0xff] %vm1261_vm1, %v1232_v61 }
 0x285   :  { %v1572_v62 = vpop.f32.mrb[28].mxu1 }
 0x286   :  { %1323 = vst.msk [vmem:[%s2110_s2 + $0x1e8] sm:$0xff] %vm1261_vm1, %v1572_v62  ;;  %v1242_v63 = vpop.f32.mrb[29].mxu1 }
 0x287   :  { %1322 = vst.msk [vmem:[%s2110_s2 + $0x1e0] sm:$0xff] %vm1261_vm1, %v1242_v63 }
 0x289   :  { %v1575_v3 = vpop.f32.mrb[30].mxu1 }
 0x28a   :  { %1325 = vst.msk [vmem:[%s2110_s2 + $0x1f8] sm:$0xff] %vm1261_vm1, %v1575_v3  ;;  %v1252_v5 = vpop.f32.mrb[31].mxu1 }
 0x28b   :  { %1324 = vst.msk [vmem:[%s2110_s2 + $0x1f0] sm:$0xff] %vm1261_vm1, %v1252_v5 }
 0x28c   :  { %1330 = vsyncpa [#allocation3], 1 }
 0x28d   :  { %1331 = vsyncpa [#allocation5], 1 }

</bundles_post_ra>
